<compile_context>
chip_gen: v7x
topology: tpu7x:2x2x1
jax: 0.10.0
libtpu: 0.0.40
codegen_flags: <defaults>
</compile_context>

<pallas_src>
import functools

import jax
import jax.numpy as jnp
from jax.experimental import pallas as pl
from jax.experimental.pallas import tpu as pltpu

LANE = 128                      # lane width / MXU-native tile
TM = 128                        # node-row tile (keeps >=2 parallel steps on v7x)
TK = 256                        # neighbor/K tile for the large-graph fallback
VMEM = pltpu.MemorySpace.VMEM
RESIDENT_VMEM_BUDGET = 40 * 2**20   # sized against v7x's 64 MiB physical VMEM
VMEM_LIMIT_CAP = 48 * 2**20         # explicit cap: safe on v5e/v6e/v7x


def _round_up(x, m):
    return (x + m - 1) // m * m


def _pad2(x, rows, cols):
    return jnp.pad(x, ((0, rows - x.shape[0]), (0, cols - x.shape[1])))


def _resident_vmem_bytes(n_pad, f_in, f_out, tm):
    # double-buffered upper bound: A row-panel + resident X/W + output tile
    a_panel = tm * n_pad * 2
    x_full = n_pad * f_in * 2
    w_full = f_in * f_out * 2
    out_t = tm * f_out * 4
    return 2 * (a_panel + x_full + w_full + out_t)


# ---------------------------------------------------------------------------
# Shared finalize: bias already added; ReLU or masked log-softmax (f32 math).
# ---------------------------------------------------------------------------
def _apply_activation(z, activation, valid_cols, out_dtype):
    if activation == "relu":
        return jnp.maximum(z, 0.0).astype(out_dtype)
    # log-softmax restricted to the first `valid_cols` class lanes
    col = jax.lax.broadcasted_iota(jnp.int32, z.shape, 1)
    z = jnp.where(col < valid_cols, z, -1e30)
    z_max = jnp.max(z, axis=1, keepdims=True)
    zs = z - z_max
    lse = jnp.log(jnp.sum(jnp.exp(zs), axis=1, keepdims=True))
    return (zs - lse).astype(out_dtype)


# ---------------------------------------------------------------------------
# Fused GCNConv kernels:  out = act( A @ (X @ W) + b )
# ---------------------------------------------------------------------------
def _make_resident_kernel(activation, valid_cols):
    """Small-graph path: X/W fully VMEM-resident, no K grid axis, no scratch."""
    def kernel(a_ref, x_ref, w_ref, b_ref, o_ref):
        # feature transform (tiny): bf16 MXU inputs, f32 accumulation
        xw = jnp.dot(x_ref[...], w_ref[...],
                     preferred_element_type=jnp.float32).astype(jnp.bfloat16)
        # aggregation over the full neighbor axis: (TM, n_pad) @ (n_pad, f_out)
        z = jnp.dot(a_ref[...], xw,
                    preferred_element_type=jnp.float32) + b_ref[...]
        o_ref[...] = _apply_activation(z, activation, valid_cols, o_ref.dtype)
    return kernel


def _make_ktiled_kernel(activation, valid_cols):
    """Large-graph fallback: K-tiled aggregation, f32 VMEM accumulator (P3)."""
    def kernel(a_ref, x_ref, w_ref, b_ref, o_ref, acc_ref):
        k = pl.program_id(1)

        @pl.when(k == 0)
        def _init():
            acc_ref[...] = jnp.zeros_like(acc_ref)

        xw = jnp.dot(x_ref[...], w_ref[...],
                     preferred_element_type=jnp.float32).astype(jnp.bfloat16)
        acc_ref[...] += jnp.dot(a_ref[...], xw,
                                preferred_element_type=jnp.float32)

        @pl.when(k == pl.num_programs(1) - 1)
        def _finalize():
            z = acc_ref[...] + b_ref[...]
            o_ref[...] = _apply_activation(z, activation, valid_cols,
                                           o_ref.dtype)
    return kernel


def gcn_conv(a, x, w, b, *, activation, valid_cols, out_dtype, resident,
             tm=TM, tk=TK):
    """One fused GCNConv layer: act(A @ (X @ W) + b)."""
    n_pad = a.shape[0]
    f_in = x.shape[1]
    f_out = w.shape[1]

    cost = pl.CostEstimate(
        flops=2 * n_pad * n_pad * f_out + 2 * n_pad * f_in * f_out,
        transcendentals=(n_pad * f_out if activation == "log_softmax" else 0),
        bytes_accessed=(a.size * 2 + x.size * 2 + w.size * 2 + b.size * 4
                        + n_pad * f_out * jnp.dtype(out_dtype).itemsize))

    if resident:
        grid = (n_pad // tm,)
        in_specs = [
            pl.BlockSpec((tm, n_pad), lambda i: (i, 0), memory_space=VMEM),
            pl.BlockSpec((n_pad, f_in), lambda i: (0, 0), memory_space=VMEM),
            pl.BlockSpec((f_in, f_out), lambda i: (0, 0), memory_space=VMEM),
            pl.BlockSpec((1, f_out), lambda i: (0, 0), memory_space=VMEM),
        ]
        out_specs = pl.BlockSpec((tm, f_out), lambda i: (i, 0),
                                 memory_space=VMEM)
        scratch = []
        kernel = _make_resident_kernel(activation, valid_cols)
        semantics = ("parallel",)
        block_bytes = (tm * n_pad * 2 + n_pad * f_in * 2 + f_in * f_out * 2
                       + f_out * 4 + tm * f_out * 4)
    else:
        grid = (n_pad // tm, n_pad // tk)
        in_specs = [
            pl.BlockSpec((tm, tk), lambda i, k: (i, k), memory_space=VMEM),
            pl.BlockSpec((tk, f_in), lambda i, k: (k, 0), memory_space=VMEM),
            pl.BlockSpec((f_in, f_out), lambda i, k: (0, 0), memory_space=VMEM),
            pl.BlockSpec((1, f_out), lambda i, k: (0, 0), memory_space=VMEM),
        ]
        out_specs = pl.BlockSpec((tm, f_out), lambda i, k: (i, 0),
                                 memory_space=VMEM)
        scratch = [pltpu.VMEM((tm, f_out), jnp.float32)]
        kernel = _make_ktiled_kernel(activation, valid_cols)
        semantics = ("parallel", "arbitrary")
        block_bytes = (tm * tk * 2 + tk * f_in * 2 + f_in * f_out * 2
                       + f_out * 4 + tm * f_out * 4 + tm * f_out * 4)

    # Explicit VMEM limit: 3x per-step working set (double-buffer + headroom),
    # clamped so it also fits v7x's 64 MiB physical / v5e's smaller default.
    vmem_limit = int(min(max(3 * block_bytes, 16 * 2**20), VMEM_LIMIT_CAP))

    return pl.pallas_call(
        kernel,
        out_shape=jax.ShapeDtypeStruct((n_pad, f_out), out_dtype),
        grid_spec=pltpu.PrefetchScalarGridSpec(
            num_scalar_prefetch=0,
            grid=grid,
            in_specs=in_specs,
            out_specs=out_specs,
            scratch_shapes=scratch),
        compiler_params=pltpu.CompilerParams(
            dimension_semantics=semantics,
            vmem_limit_bytes=vmem_limit),
        cost_estimate=cost,
    )(a, x, w, b)


# ---------------------------------------------------------------------------
# Forward pass of GCN_Net:
#   log_softmax( A_hat @ (relu(A_hat @ (X@W1) + b1) @ W2) + b2 , axis=1 )
# Dropout(p) is identity at inference time.
# ---------------------------------------------------------------------------
@functools.partial(jax.jit, static_argnums=(6, 7))
def gcn_forward(a_hat, x, w1, b1, w2, b2, num_classes, force_ktiled=False):
    n, f = x.shape
    hidden = w1.shape[1]

    # Pad reduction dim of layer 1 only to 16 (bf16 sublane packing), NOT 128.
    f_pad = _round_up(f, 16)
    h_pad = _round_up(hidden, LANE)        # lane-dense hidden (= layer-2 K dim)
    c_pad = _round_up(num_classes, LANE)   # lane-dense class logits

    # Choose residency mode from static shapes (v7x 64 MiB-safe budget).
    n_tm = _round_up(n, TM)
    resident = (not force_ktiled) and (
        _resident_vmem_bytes(n_tm, max(f_pad, h_pad), max(h_pad, c_pad), TM)
        <= RESIDENT_VMEM_BUDGET)
    n_pad = n_tm if resident else _round_up(n, max(TM, TK))

    # Zero-pad to tile-dense shapes; MXU operands in bf16, bias in f32.
    a_p = _pad2(a_hat, n_pad, n_pad).astype(jnp.bfloat16)
    x_p = _pad2(x, n_pad, f_pad).astype(jnp.bfloat16)
    w1_p = _pad2(w1, f_pad, h_pad).astype(jnp.bfloat16)
    w2_p = _pad2(w2, h_pad, c_pad).astype(jnp.bfloat16)
    b1_p = _pad2(b1, 1, h_pad).astype(jnp.float32)
    b2_p = _pad2(b2, 1, c_pad).astype(jnp.float32)

    # --- GCNConv 1 + ReLU (Dropout is a no-op in eval) ---
    h = gcn_conv(a_p, x_p, w1_p, b1_p, activation="relu",
                 valid_cols=hidden, out_dtype=jnp.bfloat16, resident=resident)
    # --- GCNConv 2 + LogSoftmax(dim=1) ---
    out = gcn_conv(a_p, h, w2_p, b2_p, activation="log_softmax",
                   valid_cols=num_classes, out_dtype=jnp.float32,
                   resident=resident)
    return out[:n, :num_classes]


# ---------------------------------------------------------------------------
# Glue: dense GCN-normalized adjacency from edge_index (plain JAX).
#   A_hat = D^{-1/2} (A + I_remaining) D^{-1/2}; duplicate edges scatter-add,
#   self-loops added only where missing (matches PyG add_remaining_self_loops).
# ---------------------------------------------------------------------------
def build_normalized_adjacency(edge_index, num_nodes):
    src, dst = edge_index[0], edge_index[1]
    adj = jnp.zeros((num_nodes, num_nodes), jnp.float32).at[dst, src].add(1.0)
    diag = jnp.diagonal(adj)
    adj = adj + jnp.diag(jnp.where(diag == 0.0, 1.0, 0.0))
    deg = jnp.sum(adj, axis=1)
    dinv_sqrt = jnp.where(deg > 0, jax.lax.rsqrt(deg), 0.0)
    return dinv_sqrt[:, None] * adj * dinv_sqrt[None, :]


def glorot(key, shape):
    fan_in, fan_out = shape
    limit = jnp.sqrt(6.0 / (fan_in + fan_out))
    return jax.random.uniform(key, shape, jnp.float32, -limit, limit)


def gcn_reference(a_hat, x, w1, b1, w2, b2):
    h = jnp.maximum(a_hat @ (x @ w1) + b1, 0.0)
    z = a_hat @ (h @ w2) + b2
    return jax.nn.log_softmax(z, axis=1)


if __name__ == "__main__":
    # dataset.num_features = 8, args.hidden = 32, dataset.num_classes = 4
    N_NODES, N_FEATS, HIDDEN, N_CLASSES, N_EDGES = 200, 8, 32, 4, 800

    key = jax.random.PRNGKey(0)
    k_x, k_e, k_w1, k_w2 = jax.random.split(key, 4)

    # data.x : [N, F]
    x = jax.random.normal(k_x, (N_NODES, N_FEATS), dtype=jnp.float32)
    # data.edge_index : [2, E]
    edge_index = jax.random.randint(k_e, (2, N_EDGES), 0, N_NODES,
                                    dtype=jnp.int32)

    # Parameters (GCNConv: weight [in, out], bias [out])
    w1 = glorot(k_w1, (N_FEATS, HIDDEN))
    b1 = jnp.zeros((1, HIDDEN), jnp.float32)
    w2 = glorot(k_w2, (HIDDEN, N_CLASSES))
    b2 = jnp.zeros((1, N_CLASSES), jnp.float32)

    a_hat = build_normalized_adjacency(edge_index, N_NODES)

    # Fused resident path (selected automatically at this scale).
    out = gcn_forward(a_hat, x, w1, b1, w2, b2, N_CLASSES, False)
    out = jax.block_until_ready(out)
    # Also exercise the large-graph K-tiled fallback path.
    out_kt = gcn_forward(a_hat, x, w1, b1, w2, b2, N_CLASSES, True)
    out_kt = jax.block_until_ready(out_kt)

    # Sanity checks
    assert out.shape == (N_NODES, N_CLASSES)
    row_sums = jnp.sum(jnp.exp(out), axis=1)           # log-softmax rows sum to 1
    assert bool(jnp.all(jnp.abs(row_sums - 1.0) < 1e-4))
    ref = gcn_reference(a_hat, x, w1, b1, w2, b2)      # f32 reference (bf16 MXU -> loose tol)
    assert bool(jnp.max(jnp.abs(out - ref)) < 0.1)
    assert bool(jnp.max(jnp.abs(out_kt - ref)) < 0.1)
    assert bool(jnp.max(jnp.abs(out_kt - out)) < 0.05)

    print("KERNEL_OK")
</pallas_src>

<mosaic_0001>
module attributes {stable_mosaic.version = 11 : i64} {
  func.func @kernel(%arg0: i32, %arg1: memref<128x256xbf16, #tpu.memory_space<vmem>>, %arg2: memref<256x16xbf16, #tpu.memory_space<vmem>>, %arg3: memref<16x128xbf16, #tpu.memory_space<vmem>>, %arg4: memref<1x128xf32, #tpu.memory_space<vmem>>, %arg5: memref<128x128xbf16, #tpu.memory_space<vmem>>) attributes {dimension_semantics = [#tpu.dimension_semantics<parallel>], iteration_bounds = array<i64: 2>, scalar_prefetch = 0 : i64, scratch_operands = 0 : i64, tpu.core_type = #tpu.core_type<tc>, window_params = [{transform_indices = @transform_0, window_bounds = array<i64: 128, 256>}, {pipeline_mode = #tpu.pipeline_mode<synchronous>, transform_indices = @transform_1, window_bounds = array<i64: 256, 16>}, {pipeline_mode = #tpu.pipeline_mode<synchronous>, transform_indices = @transform_2, window_bounds = array<i64: 16, 128>}, {pipeline_mode = #tpu.pipeline_mode<synchronous>, transform_indices = @transform_3, window_bounds = array<i64: 1, 128>}, {transform_indices = @transform_4, window_bounds = array<i64: 128, 128>}]} {
    %c0 = arith.constant 0 : index
    %c0_0 = arith.constant 0 : index
    %0 = vector.load %arg2[%c0, %c0_0] : memref<256x16xbf16, #tpu.memory_space<vmem>>, vector<256x16xbf16>
    %c0_1 = arith.constant 0 : index
    %c0_2 = arith.constant 0 : index
    %1 = vector.load %arg3[%c0_1, %c0_2] : memref<16x128xbf16, #tpu.memory_space<vmem>>, vector<16x128xbf16>
    %cst = arith.constant dense<0.000000e+00> : vector<256x128xf32>
    %2 = tpu.matmul %0, %1, %cst {dimension_numbers = #tpu.dot_dimension_numbers<[1], [0], [0], [1], [0, 0, 1, 1], [], []>} : vector<256x16xbf16>, vector<16x128xbf16>, vector<256x128xf32> -> vector<256x128xf32>
    %3 = arith.truncf %2 : vector<256x128xf32> to vector<256x128xbf16>
    %c0_3 = arith.constant 0 : index
    %c0_4 = arith.constant 0 : index
    %4 = vector.load %arg1[%c0_3, %c0_4] : memref<128x256xbf16, #tpu.memory_space<vmem>>, vector<128x256xbf16>
    %cst_5 = arith.constant dense<0.000000e+00> : vector<128x128xf32>
    %5 = tpu.matmul %4, %3, %cst_5 {dimension_numbers = #tpu.dot_dimension_numbers<[1], [0], [0], [1], [0, 0, 1, 1], [], []>} : vector<128x256xbf16>, vector<256x128xbf16>, vector<128x128xf32> -> vector<128x128xf32>
    %c0_6 = arith.constant 0 : index
    %c0_7 = arith.constant 0 : index
    %6 = vector.load %arg4[%c0_6, %c0_7] : memref<1x128xf32, #tpu.memory_space<vmem>>, vector<1x128xf32>
    %7 = vector.broadcast %6 : vector<1x128xf32> to vector<128x128xf32>
    %8 = arith.addf %5, %7 : vector<128x128xf32>
    %cst_8 = arith.constant 0.000000e+00 : f32
    %9 = vector.broadcast %cst_8 : f32 to vector<128x128xf32>
    %10 = arith.maximumf %8, %9 : vector<128x128xf32>
    %11 = arith.truncf %10 : vector<128x128xf32> to vector<128x128xbf16>
    %c0_9 = arith.constant 0 : index
    %c0_10 = arith.constant 0 : index
    %12 = vector.load %arg5[%c0_9, %c0_10] : memref<128x128xbf16, #tpu.memory_space<vmem>>, vector<128x128xbf16>
    tpu.vector_store %arg5[%c0_9, %c0_10], %11 {strides = array<i32>} : memref<128x128xbf16, #tpu.memory_space<vmem>>, vector<128x128xbf16>,
    return
  }
  func.func @transform_0(%arg0: i32) -> (i32, i32) {
    %c0_i32 = arith.constant 0 : i32
    %c0_i32_0 = arith.constant 0 : i32
    return %arg0, %c0_i32 : i32, i32
  }
  func.func @transform_1(%arg0: i32) -> (i32, i32) {
    %c0_i32 = arith.constant 0 : i32
    %c0_i32_0 = arith.constant 0 : i32
    %c0_i32_1 = arith.constant 0 : i32
    return %c0_i32, %c0_i32_0 : i32, i32
  }
  func.func @transform_2(%arg0: i32) -> (i32, i32) {
    %c0_i32 = arith.constant 0 : i32
    %c0_i32_0 = arith.constant 0 : i32
    %c0_i32_1 = arith.constant 0 : i32
    return %c0_i32, %c0_i32_0 : i32, i32
  }
  func.func @transform_3(%arg0: i32) -> (i32, i32) {
    %c0_i32 = arith.constant 0 : i32
    %c0_i32_0 = arith.constant 0 : i32
    %c0_i32_1 = arith.constant 0 : i32
    return %c0_i32, %c0_i32_0 : i32, i32
  }
  func.func @transform_4(%arg0: i32) -> (i32, i32) {
    %c0_i32 = arith.constant 0 : i32
    %c0_i32_0 = arith.constant 0 : i32
    return %arg0, %c0_i32 : i32, i32
  }
}

module attributes {stable_mosaic.version = 11 : i64} {
  func.func @kernel(%arg0: i32, %arg1: memref<128x256xbf16, #tpu.memory_space<vmem>>, %arg2: memref<256x128xbf16, #tpu.memory_space<vmem>>, %arg3: memref<128x128xbf16, #tpu.memory_space<vmem>>, %arg4: memref<1x128xf32, #tpu.memory_space<vmem>>, %arg5: memref<128x128xf32, #tpu.memory_space<vmem>>) attributes {dimension_semantics = [#tpu.dimension_semantics<parallel>], iteration_bounds = array<i64: 2>, scalar_prefetch = 0 : i64, scratch_operands = 0 : i64, tpu.core_type = #tpu.core_type<tc>, window_params = [{transform_indices = @transform_0, window_bounds = array<i64: 128, 256>}, {pipeline_mode = #tpu.pipeline_mode<synchronous>, transform_indices = @transform_1, window_bounds = array<i64: 256, 128>}, {pipeline_mode = #tpu.pipeline_mode<synchronous>, transform_indices = @transform_2, window_bounds = array<i64: 128, 128>}, {pipeline_mode = #tpu.pipeline_mode<synchronous>, transform_indices = @transform_3, window_bounds = array<i64: 1, 128>}, {transform_indices = @transform_4, window_bounds = array<i64: 128, 128>}]} {
    %c0 = arith.constant 0 : index
    %c0_0 = arith.constant 0 : index
    %0 = vector.load %arg2[%c0, %c0_0] : memref<256x128xbf16, #tpu.memory_space<vmem>>, vector<256x128xbf16>
    %c0_1 = arith.constant 0 : index
    %c0_2 = arith.constant 0 : index
    %1 = vector.load %arg3[%c0_1, %c0_2] : memref<128x128xbf16, #tpu.memory_space<vmem>>, vector<128x128xbf16>
    %cst = arith.constant dense<0.000000e+00> : vector<256x128xf32>
    %2 = tpu.matmul %0, %1, %cst {dimension_numbers = #tpu.dot_dimension_numbers<[1], [0], [0], [1], [0, 0, 1, 1], [], []>} : vector<256x128xbf16>, vector<128x128xbf16>, vector<256x128xf32> -> vector<256x128xf32>
    %3 = arith.truncf %2 : vector<256x128xf32> to vector<256x128xbf16>
    %c0_3 = arith.constant 0 : index
    %c0_4 = arith.constant 0 : index
    %4 = vector.load %arg1[%c0_3, %c0_4] : memref<128x256xbf16, #tpu.memory_space<vmem>>, vector<128x256xbf16>
    %cst_5 = arith.constant dense<0.000000e+00> : vector<128x128xf32>
    %5 = tpu.matmul %4, %3, %cst_5 {dimension_numbers = #tpu.dot_dimension_numbers<[1], [0], [0], [1], [0, 0, 1, 1], [], []>} : vector<128x256xbf16>, vector<256x128xbf16>, vector<128x128xf32> -> vector<128x128xf32>
    %c0_6 = arith.constant 0 : index
    %c0_7 = arith.constant 0 : index
    %6 = vector.load %arg4[%c0_6, %c0_7] : memref<1x128xf32, #tpu.memory_space<vmem>>, vector<1x128xf32>
    %7 = vector.broadcast %6 : vector<1x128xf32> to vector<128x128xf32>
    %8 = arith.addf %5, %7 : vector<128x128xf32>
    %9 = tpu.iota {dimensions = array<i32: 1>} : vector<128x128xi32>
    %c4_i32 = arith.constant 4 : i32
    %10 = vector.broadcast %c4_i32 : i32 to vector<128x128xi32>
    %11 = arith.cmpi slt, %9, %10 : vector<128x128xi32>
    %cst_8 = arith.constant -1.000000e+30 : f32
    %12 = vector.broadcast %cst_8 : f32 to vector<128x128xf32>
    %13 = arith.select %11, %8, %12 : vector<128x128xi1>, vector<128x128xf32>
    %cst_9 = arith.constant dense<0xFF800000> : vector<128xf32>
    %14 = vector.multi_reduction <maximumf>, %13, %cst_9 [1] : vector<128x128xf32> to vector<128xf32>
    %15 = vector.shape_cast %14 : vector<128xf32> to vector<128x1xf32>
    %16 = vector.broadcast %15 : vector<128x1xf32> to vector<128x128xf32>
    %17 = arith.subf %13, %16 : vector<128x128xf32>
    %18 = math.exp %17 : vector<128x128xf32>
    %cst_10 = arith.constant dense<0.000000e+00> : vector<128xf32>
    %19 = vector.multi_reduction <add>, %18, %cst_10 [1] : vector<128x128xf32> to vector<128xf32>
    %20 = vector.shape_cast %19 : vector<128xf32> to vector<128x1xf32>
    %21 = math.log %20 : vector<128x1xf32>
    %22 = vector.broadcast %21 : vector<128x1xf32> to vector<128x128xf32>
    %23 = arith.subf %17, %22 : vector<128x128xf32>
    %c0_11 = arith.constant 0 : index
    %c0_12 = arith.constant 0 : index
    %24 = vector.load %arg5[%c0_11, %c0_12] : memref<128x128xf32, #tpu.memory_space<vmem>>, vector<128x128xf32>
    tpu.vector_store %arg5[%c0_11, %c0_12], %23 {strides = array<i32>} : memref<128x128xf32, #tpu.memory_space<vmem>>, vector<128x128xf32>,
    return
  }
  func.func @transform_0(%arg0: i32) -> (i32, i32) {
    %c0_i32 = arith.constant 0 : i32
    %c0_i32_0 = arith.constant 0 : i32
    return %arg0, %c0_i32 : i32, i32
  }
  func.func @transform_1(%arg0: i32) -> (i32, i32) {
    %c0_i32 = arith.constant 0 : i32
    %c0_i32_0 = arith.constant 0 : i32
    %c0_i32_1 = arith.constant 0 : i32
    return %c0_i32, %c0_i32_0 : i32, i32
  }
  func.func @transform_2(%arg0: i32) -> (i32, i32) {
    %c0_i32 = arith.constant 0 : i32
    %c0_i32_0 = arith.constant 0 : i32
    %c0_i32_1 = arith.constant 0 : i32
    return %c0_i32, %c0_i32_0 : i32, i32
  }
  func.func @transform_3(%arg0: i32) -> (i32, i32) {
    %c0_i32 = arith.constant 0 : i32
    %c0_i32_0 = arith.constant 0 : i32
    %c0_i32_1 = arith.constant 0 : i32
    return %c0_i32, %c0_i32_0 : i32, i32
  }
  func.func @transform_4(%arg0: i32) -> (i32, i32) {
    %c0_i32 = arith.constant 0 : i32
    %c0_i32_0 = arith.constant 0 : i32
    return %arg0, %c0_i32 : i32, i32
  }
}

</mosaic_0001>

<bundles_post_ra>
// kernel: gcn_forward.2
= control target key start
LH: loop header
LB: loop body
LE: loop exit
PB: predicated region body
PF: predicated region fallthrough
CT: control target
= control target key end

     0   :  { %s1258_s15 = smov 0   ;;  %s1397_s0 = inlined_call_operand.vmem [shape: bf16[256,256], index: 0, kind: input, shape index: {}]   ;;  %s1398_s1 = inlined_call_operand.vmem [shape: bf16[256,16], index: 1, kind: input, shape index: {}]   ;;  %s1399_s2 = inlined_call_operand.vmem [shape: bf16[16,128], index: 2, kind: input, shape index: {}]   ;;  %s1400_s3 = inlined_call_operand.vmem [shape: f32[1,128], index: 3, kind: input, shape index: {}]   ;;  %s1401_s4 = inlined_call_operand.vmem [shape: bf16[256,128], index: 4, kind: output, shape index: {}]  }
   0x1 LB: > { %s903_s16 = sadd.s32 4294967295, %s1231_s15   ;;  %p907_p0 = scmp.ge.s32.totalorder %s1231_s15, 1  ;;  %s1231_s15 = sphi %s1258_s15, %s14_s15  }
   0x2   : > { %p164_p1 = scmp.lt.s32.totalorder %s1231_s15, 3 }
   0x4   : > { %p165_p2 = pnand %p907_p0, %p164_p1 }
   0x5   : > { %v1184_v0 = vld [vmem:[%s1399_s2] sm:$0xff] (!%p165_p2)   ;;  %vm325_vm0 = vcmask (!%p165_p2), 130048   ;;  %v1186_v2 = vld [vmem:[%s1398_s1 + $0x8] sm:$0xff] (!%p165_p2)   ;;  %v1187_v3 = vld [vmem:[%s1398_s1 + $0x10] sm:$0xff] (!%p165_p2)   ;;  %s908_s27 = sshll.u32 (!%p165_p2), %s903_s16, 4 }
   0x6   : > { %168 = sbr.rel (%p165_p2) target bundleno = 563 (0x233), region = 36  ;;  %v1185_v1 = vld [vmem:[%s1398_s1] sm:$0xff] (!%p165_p2)   ;;  %1126 = vmatprep.subr.bf16.mxu0 (!%p165_p2), %v1184_v0  ;;  %v1188_v4 = vld [vmem:[%s1398_s1 + $0x18] sm:$0xff] (!%p165_p2)   ;;  %v1190_v6 = vld [vmem:[%s1398_s1 + $0x28] sm:$0xff] (!%p165_p2)   ;;  %p192_p3 = scmp.lt.s32.totalorder (!%p165_p2), %s908_s27, 31 }
   0x7   : > { %1127 = vmatpush3.bf16.msra.mxu0 (!%p165_p2), %v1184_v0  ;;  %1128 = vmatprep.mubr.msk.bf16.mxu0 (!%p165_p2), %vm325_vm0, %v1185_v1  ;;  %v1189_v5 = vld [vmem:[%s1398_s1 + $0x20] sm:$0xff] (!%p165_p2)   ;;  %v1191_v7 = vld [vmem:[%s1398_s1 + $0x30] sm:$0xff] (!%p165_p2)   ;;  %v1192_v8 = vld [vmem:[%s1398_s1 + $0x38] sm:$0xff] (!%p165_p2)  }
   0x8   : > { %v1193_v9 = vld [vmem:[%s1398_s1 + $0x40] sm:$0xff] (!%p165_p2)   ;;  %v1194_v10 = vld [vmem:[%s1398_s1 + $0x48] sm:$0xff] (!%p165_p2)   ;;  %v1195_v11 = vld [vmem:[%s1398_s1 + $0x50] sm:$0xff] (!%p165_p2)  }
   0x9   : > { %v1196_v12 = vld [vmem:[%s1398_s1 + $0x58] sm:$0xff] (!%p165_p2)   ;;  %v1197_v13 = vld [vmem:[%s1398_s1 + $0x60] sm:$0xff] (!%p165_p2)   ;;  %v1198_v14 = vld [vmem:[%s1398_s1 + $0x68] sm:$0xff] (!%p165_p2)  }
   0xa   : > { %1129 = vmatmul.mubr.msk.bf16.vlgmr.msra.gmra.mrb[0].mxu0 (!%p165_p2), %vm325_vm0, %v1186_v2  ;;  %v1199_v15 = vld [vmem:[%s1398_s1 + $0x70] sm:$0xff] (!%p165_p2)   ;;  %v1200_v16 = vld [vmem:[%s1398_s1 + $0x78] sm:$0xff] (!%p165_p2)  }
   0xb   : > { %1132 = vmatprep.mubr.msk.bf16.mxu0 (!%p165_p2), %vm325_vm0, %v1187_v3 }
   0xd   : > { %s1403_s27 = smov (!%p192_p3, %s908_s27), 31 }
   0xe   : > { %s981_s28 = sshll.u32 %s1403_s27, 3  ;;  %s912_s7 = sshll.u32 %s1403_s27, 2 }
   0xf   : > { %s1341_s5 = scalar_lea.vmem %s1397_s0, %s981_s28  ;;  %s1372_s10 = scalar_lea.vmem %s1401_s4, %s912_s7 }
  0x10   : > { %v1203_v17 = vld [vmem:[%s1341_s5 + $0x14] ss:$8 sps:$4 sm:$0xff]   ;;  %v1221_v18 = vld [vmem:[%s1341_s5 + $0x4] ss:$8 sps:$4 sm:$0xff]   ;;  %v1201_v3 = vld [vmem:[%s1341_s5 + $0x10] ss:$8 sps:$4 sm:$0xff]  }
  0x11   : > { %694 = vmatprep.mubr.bf16.mxu1 %v1203_v17 }
  0x12   : > { %1133 = vmatmul.mubr.msk.bf16.gmra.mrb[4].mxu0 %vm325_vm0, %v1188_v4  ;;  %v1219_v4 = vld [vmem:[%s1341_s5] ss:$8 sps:$4 sm:$0xff]  }
  0x13   : > { %1136 = vmatprep.mubr.msk.bf16.mxu0 %vm325_vm0, %v1189_v5  ;;  %v1204_v5 = vld [vmem:[%s1341_s5 + $0x24] ss:$8 sps:$4 sm:$0xff]  }
  0x1a   : > { %1137 = vmatmul.mubr.msk.bf16.gmra.mrb[8].mxu0 %vm325_vm0, %v1190_v6  ;;  %v1206_v6 = vld [vmem:[%s1341_s5 + $0x20] ss:$8 sps:$4 sm:$0xff]  }
  0x1b   : > { %1140 = vmatprep.mubr.msk.bf16.mxu0 %vm325_vm0, %v1191_v7  ;;  %v1207_v7 = vld [vmem:[%s1341_s5 + $0x34] ss:$8 sps:$4 sm:$0xff]  }
  0x22   : > { %1141 = vmatmul.mubr.msk.bf16.gmra.mrb[12].mxu0 %vm325_vm0, %v1192_v8  ;;  %v1209_v8 = vld [vmem:[%s1341_s5 + $0x30] ss:$8 sps:$4 sm:$0xff]  }
  0x23   : > { %1144 = vmatprep.mubr.msk.bf16.mxu0 %vm325_vm0, %v1193_v9  ;;  %v1210_v9 = vld [vmem:[%s1341_s5 + $0x44] ss:$8 sps:$4 sm:$0xff]  }
  0x2a   : > { %1145 = vmatmul.mubr.msk.bf16.gmra.mrb[16].mxu0 %vm325_vm0, %v1194_v10  ;;  %v1212_v10 = vld [vmem:[%s1341_s5 + $0x40] ss:$8 sps:$4 sm:$0xff]  }
  0x2b   : > { %1148 = vmatprep.mubr.msk.bf16.mxu0 %vm325_vm0, %v1195_v11  ;;  %v1213_v11 = vld [vmem:[%s1341_s5 + $0x54] ss:$8 sps:$4 sm:$0xff]  }
  0x32   : > { %1149 = vmatmul.mubr.msk.bf16.gmra.mrb[20].mxu0 %vm325_vm0, %v1196_v12  ;;  %v1215_v12 = vld [vmem:[%s1341_s5 + $0x50] ss:$8 sps:$4 sm:$0xff]  }
  0x33   : > { %1152 = vmatprep.mubr.msk.bf16.mxu0 %vm325_vm0, %v1197_v13  ;;  %v1216_v13 = vld [vmem:[%s1341_s5 + $0x64] ss:$8 sps:$4 sm:$0xff]  }
  0x3a   : > { %1153 = vmatmul.mubr.msk.bf16.gmra.mrb[24].mxu0 %vm325_vm0, %v1198_v14  ;;  %v1218_v14 = vld [vmem:[%s1341_s5 + $0x60] ss:$8 sps:$4 sm:$0xff]  }
  0x3b   : > { %1156 = vmatprep.mubr.msk.bf16.mxu0 %vm325_vm0, %v1199_v15  ;;  %v1222_v15 = vld [vmem:[%s1341_s5 + $0x74] ss:$8 sps:$4 sm:$0xff]  }
  0x42   : > { %1157 = vmatmul.mubr.msk.bf16.gmra.mrb[28].mxu0 %vm325_vm0, %v1200_v16  ;;  %v1224_v16 = vld [vmem:[%s1341_s5 + $0x70] ss:$8 sps:$4 sm:$0xff]  }
  0x43   : > { %686 = vmatprep.mubr.bf16.mxu0 %v1221_v18 }
  0xdd   : > { %v1130_v19 = vpop.f32.mrb[0].mxu0 }
  0xde   : > { %v408_v20 = vpop.f32.mrb[1].mxu0 }
  0xdf   : > { %v1131_v21 = vpop.f32.mrb[2].mxu0 }
  0xe0   : > { %v536_v22 = vpack.c.bf16 %v1131_v21, %v1130_v19  ;;  %v411_v23 = vpop.f32.mrb[3].mxu0  ;;  %v1362_v19 = vld [vmem:[%s1400_s3] ss:$0 sm:$0xff] }
  0xe1   : > { %v535_v24 = vpack.c.bf16 %v411_v23, %v408_v20 }
  0xe5   : > { %v1134_v25 = vpop.f32.mrb[4].mxu0 }
  0xe6   : > { %v424_v26 = vpop.f32.mrb[5].mxu0 }
  0xe7   : > { %v1135_v27 = vpop.f32.mrb[6].mxu0 }
  0xe8   : > { %v538_v28 = vpack.c.bf16 %v1135_v27, %v1134_v25  ;;  %v427_v29 = vpop.f32.mrb[7].mxu0 }
  0xe9   : > { %v537_v30 = vpack.c.bf16 %v427_v29, %v424_v26 }
  0xed   : > { %v1138_v31 = vpop.f32.mrb[8].mxu0 }
  0xee   : > { %v440_v32 = vpop.f32.mrb[9].mxu0 }
  0xef   : > { %v1139_v33 = vpop.f32.mrb[10].mxu0 }
  0xf0   : > { %v540_v34 = vpack.c.bf16 %v1139_v33, %v1138_v31  ;;  %v443_v35 = vpop.f32.mrb[11].mxu0 }
  0xf1   : > { %v539_v36 = vpack.c.bf16 %v443_v35, %v440_v32 }
  0xf5   : > { %v1142_v37 = vpop.f32.mrb[12].mxu0 }
  0xf6   : > { %v456_v38 = vpop.f32.mrb[13].mxu0 }
  0xf7   : > { %v1143_v39 = vpop.f32.mrb[14].mxu0 }
  0xf8   : > { %v542_v40 = vpack.c.bf16 %v1143_v39, %v1142_v37  ;;  %v459_v41 = vpop.f32.mrb[15].mxu0 }
  0xf9   : > { %v541_v42 = vpack.c.bf16 %v459_v41, %v456_v38 }
  0xfd   : > { %v1146_v43 = vpop.f32.mrb[16].mxu0 }
  0xfe   : > { %v472_v44 = vpop.f32.mrb[17].mxu0 }
  0xff   : > { %v1147_v45 = vpop.f32.mrb[18].mxu0 }
 0x100   : > { %v544_v46 = vpack.c.bf16 %v1147_v45, %v1146_v43  ;;  %v475_v47 = vpop.f32.mrb[19].mxu0 }
 0x101   : > { %v543_v48 = vpack.c.bf16 %v475_v47, %v472_v44 }
 0x103   : > { %1062 = vmatprep.subr.bf16.mxu0 %v543_v48  ;;  %1160 = vmatprep.subr.bf16.mxu1 %v543_v48 }
 0x104   : > { %1063 = vmatpush3.bf16.msra.mxu0 %v535_v24  ;;  %1168 = vmatpush3.bf16.msra.mxu1 %v535_v24 }
 0x105   : > { %v1150_v49 = vpop.f32.mrb[20].mxu0  ;;  %1064 = vmatprep.subr.bf16.mxu0 %v544_v46  ;;  %1161 = vmatprep.subr.bf16.mxu1 %v544_v46 }
 0x106   : > { %v488_v50 = vpop.f32.mrb[21].mxu0 }
 0x107   : > { %v1151_v51 = vpop.f32.mrb[22].mxu0 }
 0x108   : > { %v546_v52 = vpack.c.bf16 %v1151_v51, %v1150_v49  ;;  %v491_v53 = vpop.f32.mrb[23].mxu0  ;;  %1065 = vmatpush3.bf16.msra.mxu0 %v536_v22  ;;  %1169 = vmatpush3.bf16.msra.mxu1 %v536_v22 }
 0x109   : > { %v545_v54 = vpack.c.bf16 %v491_v53, %v488_v50 }
 0x10b   : > { %1066 = vmatprep.subr.bf16.mxu0 %v545_v54  ;;  %1162 = vmatprep.subr.bf16.mxu1 %v545_v54 }
 0x10c   : > { %1067 = vmatpush3.bf16.msra.mxu0 %v537_v30  ;;  %1170 = vmatpush3.bf16.msra.mxu1 %v537_v30 }
 0x10d   : > { %v1154_v55 = vpop.f32.mrb[24].mxu0  ;;  %1068 = vmatprep.subr.bf16.mxu0 %v546_v52  ;;  %1163 = vmatprep.subr.bf16.mxu1 %v546_v52 }
 0x10e   : > { %v504_v56 = vpop.f32.mrb[25].mxu0 }
 0x10f   : > { %v1155_v57 = vpop.f32.mrb[26].mxu0 }
 0x110   : > { %v548_v58 = vpack.c.bf16 %v1155_v57, %v1154_v55  ;;  %v507_v59 = vpop.f32.mrb[27].mxu0  ;;  %1069 = vmatpush3.bf16.msra.mxu0 %v538_v28  ;;  %1171 = vmatpush3.bf16.msra.mxu1 %v538_v28 }
 0x111   : > { %v547_v60 = vpack.c.bf16 %v507_v59, %v504_v56 }
 0x113   : > { %1070 = vmatprep.subr.bf16.mxu0 %v547_v60  ;;  %1164 = vmatprep.subr.bf16.mxu1 %v547_v60 }
 0x114   : > { %1071 = vmatpush3.bf16.msra.mxu0 %v539_v36  ;;  %1172 = vmatpush3.bf16.msra.mxu1 %v539_v36 }
 0x115   : > { %v1158_v61 = vpop.f32.mrb[28].mxu0  ;;  %1072 = vmatprep.subr.bf16.mxu0 %v548_v58  ;;  %1165 = vmatprep.subr.bf16.mxu1 %v548_v58 }
 0x116   : > { %v520_v62 = vpop.f32.mrb[29].mxu0 }
 0x117   : > { %v1159_v63 = vpop.f32.mrb[30].mxu0 }
 0x118   : > { %v550_v0 = vpack.c.bf16 %v1159_v63, %v1158_v61  ;;  %v523_v1 = vpop.f32.mrb[31].mxu0  ;;  %1073 = vmatpush3.bf16.msra.mxu0 %v540_v34  ;;  %1173 = vmatpush3.bf16.msra.mxu1 %v540_v34 }
 0x119   : > { %v549_v2 = vpack.c.bf16 %v523_v1, %v520_v62 }
 0x11b   : > { %1074 = vmatprep.subr.bf16.mxu0 %v549_v2  ;;  %1166 = vmatprep.subr.bf16.mxu1 %v549_v2 }
 0x11c   : > { %1075 = vmatpush3.bf16.msra.mxu0 %v541_v42  ;;  %1174 = vmatpush3.bf16.msra.mxu1 %v541_v42 }
 0x11d   : > { %1076 = vmatprep.subr.bf16.mxu0 %v550_v0  ;;  %1167 = vmatprep.subr.bf16.mxu1 %v550_v0 }
 0x120   : > { %1077 = vmatpush3.bf16.msra.mxu0 %v542_v40  ;;  %1175 = vmatpush3.bf16.msra.mxu1 %v542_v40 }
 0x123   : > { %695 = vmatmul.mubr.bf16.vlgmr.msra.gmra.mrb[0].mxu1 %v1201_v3  ;;  %687 = vmatmul.mubr.bf16.vlgmr.msra.gmra.mrb[32].mxu0 %v1219_v4 }
 0x124   : > { %702 = vmatprep.mubr.bf16.mxu1 %v1204_v5 }
 0x12b   : > { %703 = vmatmul.mubr.bf16.gmra.mrb[4].mxu1 %v1206_v6 }
 0x12c   : > { %710 = vmatprep.mubr.bf16.mxu1 %v1207_v7 }
 0x133   : > { %711 = vmatmul.mubr.bf16.gmra.mrb[8].mxu1 %v1209_v8 }
 0x134   : > { %718 = vmatprep.mubr.bf16.mxu1 %v1210_v9 }
 0x13b   : > { %719 = vmatmul.mubr.bf16.gmra.mrb[12].mxu1 %v1212_v10 }
 0x13c   : > { %726 = vmatprep.mubr.bf16.mxu1 %v1213_v11 }
 0x143   : > { %727 = vmatmul.mubr.bf16.gmra.mrb[16].mxu1 %v1215_v12 }
 0x144   : > { %734 = vmatprep.mubr.bf16.mxu1 %v1216_v13 }
 0x14b   : > { %735 = vmatmul.mubr.bf16.gmra.mrb[20].mxu1 %v1218_v14 }
 0x14c   : > { %742 = vmatprep.mubr.bf16.mxu1 %v1222_v15 }
 0x153   : > { %743 = vmatmul.mubr.bf16.gmra.mrb[24].mxu1 %v1224_v16 }
 0x1f6   : > { %v1084_v17 = vpop.f32.mrb[0].mxu1  ;;  %v1078_v18 = vpop.f32.mrb[32].mxu0 }
 0x1f7   : > { %v1085_v20 = vpop.f32.mrb[1].mxu1  ;;  %v1079_v21 = vpop.f32.mrb[33].mxu0 }
 0x1f8   : > { %v1086_v22 = vadd.f32 %v1085_v20, %v1084_v17  ;;  %v1087_v23 = vpop.f32.mrb[2].mxu1  ;;  %v1080_v24 = vadd.f32 %v1079_v21, %v1078_v18  ;;  %v1081_v25 = vpop.f32.mrb[34].mxu0 }
 0x1f9   : > { %v1088_v26 = vpop.f32.mrb[3].mxu1  ;;  %v1082_v27 = vpop.f32.mrb[35].mxu0 }
 0x1fa   : > { %v697_v28 = vadd.f32 %v1086_v22, %v1362_v19  ;;  %v1089_v29 = vadd.f32 %v1088_v26, %v1087_v23  ;;  %v689_v30 = vadd.f32 %v1080_v24, %v1362_v19  ;;  %v1083_v31 = vadd.f32 %v1082_v27, %v1081_v25 }
 0x1fc   : > { %v700_v32 = vadd.f32 %v1089_v29, %v1362_v19  ;;  %v751_v33 = vmax.f32 %v689_v30, 0.0  ;;  %v692_v34 = vadd.f32 %v1083_v31, %v1362_v19  ;;  %v753_v35 = vmax.f32 %v697_v28, 0.0 }
 0x1fe   : > { %v754_v36 = vmax.f32 %v700_v32, 0.0  ;;  %v1090_v37 = vpop.f32.mrb[4].mxu1  ;;  %v752_v38 = vmax.f32 %v692_v34, 0.0 }
 0x1ff   : > { %v1091_v39 = vpop.f32.mrb[5].mxu1 }
 0x200   : > { %v1006_v40 = vpack.c.bf16 %v754_v36, %v753_v35  ;;  %v1092_v41 = vadd.f32 %v1091_v39, %v1090_v37  ;;  %v1093_v42 = vpop.f32.mrb[6].mxu1  ;;  %v1001_v43 = vpack.c.bf16 %v752_v38, %v751_v33 }
 0x201   : > { %v1094_v44 = vpop.f32.mrb[7].mxu1 }
 0x202   : > { %1038 = vst [vmem:[%s1372_s10 + $0x8] sm:$0xff] %v1006_v40   ;;  %v705_v45 = vadd.f32 %v1092_v41, %v1362_v19  ;;  %v1095_v46 = vadd.f32 %v1094_v44, %v1093_v42  ;;  %1002 = vst [vmem:[%s1372_s10] sm:$0xff] %v1001_v43  }
 0x204   : > { %v708_v47 = vadd.f32 %v1095_v46, %v1362_v19  ;;  %v755_v48 = vmax.f32 %v705_v45, 0.0 }
 0x206   : > { %v756_v49 = vmax.f32 %v708_v47, 0.0  ;;  %v1096_v50 = vpop.f32.mrb[8].mxu1 }
 0x207   : > { %v1097_v51 = vpop.f32.mrb[9].mxu1 }
 0x208   : > { %v1011_v52 = vpack.c.bf16 %v756_v49, %v755_v48  ;;  %v1098_v53 = vadd.f32 %v1097_v51, %v1096_v50  ;;  %v1099_v54 = vpop.f32.mrb[10].mxu1 }
 0x209   : > { %v1100_v55 = vpop.f32.mrb[11].mxu1 }
 0x20a   : > { %1039 = vst [vmem:[%s1372_s10 + $0x10] sm:$0xff] %v1011_v52   ;;  %v713_v56 = vadd.f32 %v1098_v53, %v1362_v19  ;;  %v1101_v57 = vadd.f32 %v1100_v55, %v1099_v54 }
 0x20c   : > { %v716_v58 = vadd.f32 %v1101_v57, %v1362_v19  ;;  %v757_v59 = vmax.f32 %v713_v56, 0.0 }
 0x20e   : > { %v758_v60 = vmax.f32 %v716_v58, 0.0  ;;  %v1102_v61 = vpop.f32.mrb[12].mxu1 }
 0x20f   : > { %v1103_v62 = vpop.f32.mrb[13].mxu1 }
 0x210   : > { %v1016_v63 = vpack.c.bf16 %v758_v60, %v757_v59  ;;  %v1104_v0 = vadd.f32 %v1103_v62, %v1102_v61  ;;  %v1105_v1 = vpop.f32.mrb[14].mxu1 }
 0x211   : > { %v1106_v2 = vpop.f32.mrb[15].mxu1 }
 0x212   : > { %1040 = vst [vmem:[%s1372_s10 + $0x18] sm:$0xff] %v1016_v63   ;;  %v721_v3 = vadd.f32 %v1104_v0, %v1362_v19  ;;  %v1107_v4 = vadd.f32 %v1106_v2, %v1105_v1 }
 0x214   : > { %v724_v5 = vadd.f32 %v1107_v4, %v1362_v19  ;;  %v759_v6 = vmax.f32 %v721_v3, 0.0 }
 0x216   : > { %v760_v7 = vmax.f32 %v724_v5, 0.0  ;;  %v1108_v8 = vpop.f32.mrb[16].mxu1 }
 0x217   : > { %v1109_v9 = vpop.f32.mrb[17].mxu1 }
 0x218   : > { %v1021_v10 = vpack.c.bf16 %v760_v7, %v759_v6  ;;  %v1110_v11 = vadd.f32 %v1109_v9, %v1108_v8  ;;  %v1111_v12 = vpop.f32.mrb[18].mxu1 }
 0x219   : > { %v1112_v13 = vpop.f32.mrb[19].mxu1 }
 0x21a   : > { %1041 = vst [vmem:[%s1372_s10 + $0x20] sm:$0xff] %v1021_v10   ;;  %v729_v14 = vadd.f32 %v1110_v11, %v1362_v19  ;;  %v1113_v15 = vadd.f32 %v1112_v13, %v1111_v12 }
 0x21c   : > { %v732_v16 = vadd.f32 %v1113_v15, %v1362_v19  ;;  %v761_v17 = vmax.f32 %v729_v14, 0.0 }
 0x21e   : > { %v762_v18 = vmax.f32 %v732_v16, 0.0  ;;  %v1114_v20 = vpop.f32.mrb[20].mxu1 }
 0x21f   : > { %v1115_v21 = vpop.f32.mrb[21].mxu1 }
 0x220   : > { %v1026_v22 = vpack.c.bf16 %v762_v18, %v761_v17  ;;  %v1116_v23 = vadd.f32 %v1115_v21, %v1114_v20  ;;  %v1117_v24 = vpop.f32.mrb[22].mxu1 }
 0x221   : > { %v1118_v25 = vpop.f32.mrb[23].mxu1 }
 0x222   : > { %1042 = vst [vmem:[%s1372_s10 + $0x28] sm:$0xff] %v1026_v22   ;;  %v737_v26 = vadd.f32 %v1116_v23, %v1362_v19  ;;  %v1119_v27 = vadd.f32 %v1118_v25, %v1117_v24 }
 0x224   : > { %v740_v28 = vadd.f32 %v1119_v27, %v1362_v19  ;;  %v763_v29 = vmax.f32 %v737_v26, 0.0 }
 0x226   : > { %v764_v30 = vmax.f32 %v740_v28, 0.0  ;;  %v1120_v31 = vpop.f32.mrb[24].mxu1 }
 0x227   : > { %v1121_v32 = vpop.f32.mrb[25].mxu1 }
 0x228   : > { %v1031_v33 = vpack.c.bf16 %v764_v30, %v763_v29  ;;  %v1122_v34 = vadd.f32 %v1121_v32, %v1120_v31  ;;  %v1123_v35 = vpop.f32.mrb[26].mxu1 }
 0x229   : > { %v1124_v36 = vpop.f32.mrb[27].mxu1 }
 0x22a   : > { %1043 = vst [vmem:[%s1372_s10 + $0x30] sm:$0xff] %v1031_v33   ;;  %v745_v37 = vadd.f32 %v1122_v34, %v1362_v19  ;;  %v1125_v38 = vadd.f32 %v1124_v36, %v1123_v35 }
 0x22c   : > { %v748_v39 = vadd.f32 %v1125_v38, %v1362_v19  ;;  %v765_v40 = vmax.f32 %v745_v37, 0.0 }
 0x22e   : > { %v766_v41 = vmax.f32 %v748_v39, 0.0 }
 0x230   : > { %v1036_v42 = vpack.c.bf16 %v766_v41, %v765_v40 }
 0x232   : > { %1044 = vst [vmem:[%s1372_s10 + $0x38] sm:$0xff] %v1036_v42  }
 0x233 PF: > { %s14_s15 = sadd.s32 1, %s1231_s15  }
 0x234   : > { %p11_p4 = scmp.ge.s32.totalorder %s14_s15, 4  }
 0x236   :  { %13 = sbr.rel (!%p11_p4) target bundleno = 1 (0x1), region = 66 }

// kernel: gcn_forward.3
= control target key start
LH: loop header
LB: loop body
LE: loop exit
PB: predicated region body
PF: predicated region fallthrough
CT: control target
= control target key end

     0   :  { %s1368_s15 = smov 0   ;;  %s1686_s0 = inlined_call_operand.vmem [shape: bf16[256,256], index: 0, kind: input, shape index: {}]   ;;  %s1687_s1 = inlined_call_operand.vmem [shape: bf16[256,128], index: 1, kind: input, shape index: {}]   ;;  %s1688_s2 = inlined_call_operand.vmem [shape: bf16[128,128], index: 2, kind: input, shape index: {}]   ;;  %s1689_s3 = inlined_call_operand.vmem [shape: f32[1,128], index: 3, kind: input, shape index: {}]   ;;  %s1690_s4 = inlined_call_operand.vmem [shape: f32[256,128], index: 4, kind: output, shape index: {}]  }
   0x1 LB: > { %s1025_s16 = sadd.s32 4294967295, %s1341_s15   ;;  %p1029_p0 = scmp.ge.s32.totalorder %s1341_s15, 1  ;;  %s1341_s15 = sphi %s1368_s15, %s14_s15  }
   0x2   : > { %p164_p1 = scmp.lt.s32.totalorder %s1341_s15, 3 }
   0x4   : > { %p165_p2 = pnand %p1029_p0, %p164_p1 }
   0x5   : > { %v1223_v0 = vld [vmem:[%s1688_s2] sm:$0xff] (!%p165_p2)   ;;  %v1224_v1 = vld [vmem:[%s1688_s2 + $0x8] sm:$0xff] (!%p165_p2)   ;;  %v1225_v2 = vld [vmem:[%s1688_s2 + $0x10] sm:$0xff] (!%p165_p2)   ;;  %s1030_s17 = sshll.u32 (!%p165_p2), %s1025_s16, 4 }
   0x6   : > { %168 = sbr.rel (%p165_p2) target bundleno = 910 (0x38e), region = 36  ;;  %1167 = vmatprep.subr.bf16.mxu0 (!%p165_p2), %v1223_v0  ;;  %v1226_v3 = vld [vmem:[%s1688_s2 + $0x18] sm:$0xff] (!%p165_p2)   ;;  %v1231_v4 = vld [vmem:[%s1687_s1] sm:$0xff] (!%p165_p2)   ;;  %v1228_v6 = vld [vmem:[%s1688_s2 + $0x28] sm:$0xff] (!%p165_p2)   ;;  %p192_p3 = scmp.lt.s32.totalorder (!%p165_p2), %s1030_s17, 31 }
   0x7   : > { %1168 = vmatpush3.bf16.msra.mxu0 (!%p165_p2), %v1223_v0  ;;  %1183 = vmatprep.mubr.bf16.mxu0 (!%p165_p2), %v1231_v4  ;;  %v1227_v5 = vld [vmem:[%s1688_s2 + $0x20] sm:$0xff] (!%p165_p2)   ;;  %v1229_v7 = vld [vmem:[%s1688_s2 + $0x30] sm:$0xff] (!%p165_p2)   ;;  %v1230_v8 = vld [vmem:[%s1688_s2 + $0x38] sm:$0xff] (!%p165_p2)  }
   0x8   : > { %1169 = vmatprep.subr.bf16.mxu0 (!%p165_p2), %v1224_v1  ;;  %v1232_v9 = vld [vmem:[%s1687_s1 + $0x8] sm:$0xff] (!%p165_p2)   ;;  %v1233_v10 = vld [vmem:[%s1687_s1 + $0x10] sm:$0xff] (!%p165_p2)   ;;  %v1234_v11 = vld [vmem:[%s1687_s1 + $0x18] sm:$0xff] (!%p165_p2)  }
   0x9   : > { %v1235_v12 = vld [vmem:[%s1687_s1 + $0x20] sm:$0xff] (!%p165_p2)   ;;  %v1236_v13 = vld [vmem:[%s1687_s1 + $0x28] sm:$0xff] (!%p165_p2)   ;;  %v1237_v14 = vld [vmem:[%s1687_s1 + $0x30] sm:$0xff] (!%p165_p2)  }
   0xa   : > { %v1238_v15 = vld [vmem:[%s1687_s1 + $0x38] sm:$0xff] (!%p165_p2)   ;;  %v1239_v16 = vld [vmem:[%s1687_s1 + $0x40] sm:$0xff] (!%p165_p2)   ;;  %v1240_v17 = vld [vmem:[%s1687_s1 + $0x48] sm:$0xff] (!%p165_p2)  }
   0xb   : > { %1170 = vmatpush3.bf16.msra.mxu0 (!%p165_p2), %v1224_v1  ;;  %v1241_v18 = vld [vmem:[%s1687_s1 + $0x50] sm:$0xff] (!%p165_p2)   ;;  %v1242_v19 = vld [vmem:[%s1687_s1 + $0x58] sm:$0xff] (!%p165_p2)   ;;  %v1243_v20 = vld [vmem:[%s1687_s1 + $0x60] sm:$0xff] (!%p165_p2)  }
   0xc   : > { %1171 = vmatprep.subr.bf16.mxu0 (!%p165_p2), %v1225_v2  ;;  %v1244_v21 = vld [vmem:[%s1687_s1 + $0x68] sm:$0xff] (!%p165_p2)   ;;  %v1245_v22 = vld [vmem:[%s1687_s1 + $0x70] sm:$0xff] (!%p165_p2)   ;;  %v1246_v23 = vld [vmem:[%s1687_s1 + $0x78] sm:$0xff] (!%p165_p2)  }
   0xd   : > { %s1692_s17 = smov (!%p192_p3, %s1030_s17), 31 }
   0xe   : > { %s1078_s18 = sshll.u32 %s1692_s17, 3 }
   0xf   : > { %1172 = vmatpush3.bf16.msra.mxu0 %v1225_v2  ;;  %s1458_s21 = scalar_lea.vmem %s1686_s0, %s1078_s18  ;;  %s1649_s25 = scalar_lea.vmem %s1690_s4, %s1078_s18 }
  0x10   : > { %1173 = vmatprep.subr.bf16.mxu0 %v1226_v3  ;;  %v1249_v24 = vld [vmem:[%s1458_s21 + $0x4] ss:$8 sps:$4 sm:$0xff]  }
  0x11   : > { %709 = vmatprep.mubr.bf16.mxu1 %v1249_v24  ;;  %v774_v24 = vlaneseq }
  0x13   : > { %1174 = vmatpush3.bf16.msra.mxu0 %v1226_v3 }
  0x14   : > { %1175 = vmatprep.subr.bf16.mxu0 %v1227_v5 }
  0x17   : > { %1176 = vmatpush3.bf16.msra.mxu0 %v1227_v5 }
  0x18   : > { %1177 = vmatprep.subr.bf16.mxu0 %v1228_v6 }
  0x1b   : > { %1178 = vmatpush3.bf16.msra.mxu0 %v1228_v6 }
  0x1c   : > { %1179 = vmatprep.subr.bf16.mxu0 %v1229_v7 }
  0x1f   : > { %1180 = vmatpush3.bf16.msra.mxu0 %v1229_v7 }
  0x20   : > { %1181 = vmatprep.subr.bf16.mxu0 %v1230_v8 }
  0x23   : > { %1182 = vmatpush3.bf16.msra.mxu0 %v1230_v8 }
  0x26   : > { %1184 = vmatmul.mubr.bf16.vlgmr.msra.gmra.mrb[0].mxu0 %v1232_v9  ;;  %v1247_v9 = vld [vmem:[%s1458_s21] ss:$8 sps:$4 sm:$0xff]  }
  0x27   : > { %1187 = vmatprep.mubr.bf16.mxu0 %v1233_v10  ;;  %v1250_v10 = vld [vmem:[%s1458_s21 + $0x14] ss:$8 sps:$4 sm:$0xff]  }
  0x2e   : > { %1188 = vmatmul.mubr.bf16.gmra.mrb[4].mxu0 %v1234_v11  ;;  %v1252_v11 = vld [vmem:[%s1458_s21 + $0x10] ss:$8 sps:$4 sm:$0xff]  }
  0x2f   : > { %1191 = vmatprep.mubr.bf16.mxu0 %v1235_v12  ;;  %v1253_v12 = vld [vmem:[%s1458_s21 + $0x24] ss:$8 sps:$4 sm:$0xff]  }
  0x36   : > { %1192 = vmatmul.mubr.bf16.gmra.mrb[8].mxu0 %v1236_v13  ;;  %v1255_v13 = vld [vmem:[%s1458_s21 + $0x20] ss:$8 sps:$4 sm:$0xff]  }
  0x37   : > { %1195 = vmatprep.mubr.bf16.mxu0 %v1237_v14  ;;  %v1256_v14 = vld [vmem:[%s1458_s21 + $0x34] ss:$8 sps:$4 sm:$0xff]  }
  0x3e   : > { %1196 = vmatmul.mubr.bf16.gmra.mrb[12].mxu0 %v1238_v15  ;;  %v1258_v15 = vld [vmem:[%s1458_s21 + $0x30] ss:$8 sps:$4 sm:$0xff]  }
  0x3f   : > { %1199 = vmatprep.mubr.bf16.mxu0 %v1239_v16  ;;  %v1259_v16 = vld [vmem:[%s1458_s21 + $0x44] ss:$8 sps:$4 sm:$0xff]  }
  0x46   : > { %1200 = vmatmul.mubr.bf16.gmra.mrb[16].mxu0 %v1240_v17  ;;  %v1261_v17 = vld [vmem:[%s1458_s21 + $0x40] ss:$8 sps:$4 sm:$0xff]  }
  0x47   : > { %1203 = vmatprep.mubr.bf16.mxu0 %v1241_v18  ;;  %v1262_v18 = vld [vmem:[%s1458_s21 + $0x54] ss:$8 sps:$4 sm:$0xff]  }
  0x4e   : > { %1204 = vmatmul.mubr.bf16.gmra.mrb[20].mxu0 %v1242_v19  ;;  %v1264_v19 = vld [vmem:[%s1458_s21 + $0x50] ss:$8 sps:$4 sm:$0xff]  }
  0x4f   : > { %1207 = vmatprep.mubr.bf16.mxu0 %v1243_v20  ;;  %v1265_v20 = vld [vmem:[%s1458_s21 + $0x64] ss:$8 sps:$4 sm:$0xff]  }
  0x56   : > { %1208 = vmatmul.mubr.bf16.gmra.mrb[24].mxu0 %v1244_v21  ;;  %v1267_v21 = vld [vmem:[%s1458_s21 + $0x60] ss:$8 sps:$4 sm:$0xff]  }
  0x57   : > { %1211 = vmatprep.mubr.bf16.mxu0 %v1245_v22  ;;  %v1268_v22 = vld [vmem:[%s1458_s21 + $0x74] ss:$8 sps:$4 sm:$0xff]  }
  0x5e   : > { %1212 = vmatmul.mubr.bf16.gmra.mrb[28].mxu0 %v1246_v23  ;;  %v1270_v23 = vld [vmem:[%s1458_s21 + $0x70] ss:$8 sps:$4 sm:$0xff]  }
  0xf9   : > { %v1185_v25 = vpop.f32.mrb[0].mxu0 }
  0xfa   : > { %v431_v26 = vpop.f32.mrb[1].mxu0 }
  0xfb   : > { %v1186_v27 = vpop.f32.mrb[2].mxu0 }
  0xfc   : > { %v559_v28 = vpack.c.bf16 %v1186_v27, %v1185_v25  ;;  %v434_v29 = vpop.f32.mrb[3].mxu0  ;;  %v1476_v25 = vand.u32 127, %v774_v24 }
  0xfd   : > { %v558_v30 = vpack.c.bf16 %v434_v29, %v431_v26 }
  0xfe   : > { %vm776_vm0 = vcmp.lt.s32.totalorder %v1476_v25, 4 }
 0x101   : > { %v1189_v31 = vpop.f32.mrb[4].mxu0 }
 0x102   : > { %v447_v32 = vpop.f32.mrb[5].mxu0 }
 0x103   : > { %v1190_v33 = vpop.f32.mrb[6].mxu0 }
 0x104   : > { %v561_v34 = vpack.c.bf16 %v1190_v33, %v1189_v31  ;;  %v450_v35 = vpop.f32.mrb[7].mxu0 }
 0x105   : > { %v560_v36 = vpack.c.bf16 %v450_v35, %v447_v32 }
 0x109   : > { %v1193_v37 = vpop.f32.mrb[8].mxu0 }
 0x10a   : > { %v463_v38 = vpop.f32.mrb[9].mxu0 }
 0x10b   : > { %v1194_v39 = vpop.f32.mrb[10].mxu0 }
 0x10c   : > { %v563_v40 = vpack.c.bf16 %v1194_v39, %v1193_v37  ;;  %v466_v41 = vpop.f32.mrb[11].mxu0 }
 0x10d   : > { %v562_v42 = vpack.c.bf16 %v466_v41, %v463_v38 }
 0x111   : > { %v1197_v43 = vpop.f32.mrb[12].mxu0 }
 0x112   : > { %v479_v44 = vpop.f32.mrb[13].mxu0 }
 0x113   : > { %v1198_v45 = vpop.f32.mrb[14].mxu0 }
 0x114   : > { %v565_v46 = vpack.c.bf16 %v1198_v45, %v1197_v43  ;;  %v482_v47 = vpop.f32.mrb[15].mxu0 }
 0x115   : > { %v564_v48 = vpack.c.bf16 %v482_v47, %v479_v44 }
 0x119   : > { %v1201_v49 = vpop.f32.mrb[16].mxu0 }
 0x11a   : > { %v495_v50 = vpop.f32.mrb[17].mxu0 }
 0x11b   : > { %v1202_v51 = vpop.f32.mrb[18].mxu0 }
 0x11c   : > { %v567_v52 = vpack.c.bf16 %v1202_v51, %v1201_v49  ;;  %v498_v53 = vpop.f32.mrb[19].mxu0 }
 0x11d   : > { %v566_v54 = vpack.c.bf16 %v498_v53, %v495_v50 }
 0x11f   : > { %1103 = vmatprep.subr.bf16.mxu1 %v566_v54 }
 0x120   : > { %1104 = vmatpush3.bf16.msra.mxu1 %v558_v30 }
 0x121   : > { %v1205_v55 = vpop.f32.mrb[20].mxu0  ;;  %1105 = vmatprep.subr.bf16.mxu1 %v567_v52 }
 0x122   : > { %v511_v56 = vpop.f32.mrb[21].mxu0 }
 0x123   : > { %v1206_v57 = vpop.f32.mrb[22].mxu0 }
 0x124   : > { %v569_v58 = vpack.c.bf16 %v1206_v57, %v1205_v55  ;;  %v514_v59 = vpop.f32.mrb[23].mxu0  ;;  %1106 = vmatpush3.bf16.msra.mxu1 %v559_v28  ;;  %v1481_v28 = vld [vmem:[%s1689_s3] ss:$0 sm:$0xff] }
 0x125   : > { %v568_v60 = vpack.c.bf16 %v514_v59, %v511_v56 }
 0x127   : > { %1107 = vmatprep.subr.bf16.mxu1 %v568_v60 }
 0x128   : > { %1108 = vmatpush3.bf16.msra.mxu1 %v560_v36 }
 0x129   : > { %v1209_v61 = vpop.f32.mrb[24].mxu0  ;;  %1109 = vmatprep.subr.bf16.mxu1 %v569_v58 }
 0x12a   : > { %v527_v62 = vpop.f32.mrb[25].mxu0 }
 0x12b   : > { %v1210_v63 = vpop.f32.mrb[26].mxu0 }
 0x12c   : > { %v571_v0 = vpack.c.bf16 %v1210_v63, %v1209_v61  ;;  %v530_v1 = vpop.f32.mrb[27].mxu0  ;;  %1110 = vmatpush3.bf16.msra.mxu1 %v561_v34 }
 0x12d   : > { %v570_v2 = vpack.c.bf16 %v530_v1, %v527_v62 }
 0x12f   : > { %1111 = vmatprep.subr.bf16.mxu1 %v570_v2 }
 0x130   : > { %1112 = vmatpush3.bf16.msra.mxu1 %v562_v42 }
 0x131   : > { %v1213_v3 = vpop.f32.mrb[28].mxu0  ;;  %1113 = vmatprep.subr.bf16.mxu1 %v571_v0 }
 0x132   : > { %v543_v4 = vpop.f32.mrb[29].mxu0 }
 0x133   : > { %v1214_v5 = vpop.f32.mrb[30].mxu0 }
 0x134   : > { %v573_v6 = vpack.c.bf16 %v1214_v5, %v1213_v3  ;;  %v546_v7 = vpop.f32.mrb[31].mxu0  ;;  %1114 = vmatpush3.bf16.msra.mxu1 %v563_v40 }
 0x135   : > { %v572_v8 = vpack.c.bf16 %v546_v7, %v543_v4 }
 0x137   : > { %1115 = vmatprep.subr.bf16.mxu1 %v572_v8 }
 0x138   : > { %1116 = vmatpush3.bf16.msra.mxu1 %v564_v48 }
 0x139   : > { %1117 = vmatprep.subr.bf16.mxu1 %v573_v6 }
 0x13c   : > { %1118 = vmatpush3.bf16.msra.mxu1 %v565_v46 }
 0x13f   : > { %710 = vmatmul.mubr.bf16.vlgmr.msra.gmra.mrb[0].mxu1 %v1247_v9 }
 0x140   : > { %717 = vmatprep.mubr.bf16.mxu1 %v1250_v10 }
 0x147   : > { %718 = vmatmul.mubr.bf16.gmra.mrb[4].mxu1 %v1252_v11 }
 0x148   : > { %725 = vmatprep.mubr.bf16.mxu1 %v1253_v12 }
 0x14f   : > { %726 = vmatmul.mubr.bf16.gmra.mrb[8].mxu1 %v1255_v13 }
 0x150   : > { %733 = vmatprep.mubr.bf16.mxu1 %v1256_v14 }
 0x157   : > { %734 = vmatmul.mubr.bf16.gmra.mrb[12].mxu1 %v1258_v15 }
 0x158   : > { %741 = vmatprep.mubr.bf16.mxu1 %v1259_v16 }
 0x15f   : > { %742 = vmatmul.mubr.bf16.gmra.mrb[16].mxu1 %v1261_v17 }
 0x160   : > { %749 = vmatprep.mubr.bf16.mxu1 %v1262_v18 }
 0x167   : > { %750 = vmatmul.mubr.bf16.gmra.mrb[20].mxu1 %v1264_v19 }
 0x168   : > { %757 = vmatprep.mubr.bf16.mxu1 %v1265_v20 }
 0x16f   : > { %758 = vmatmul.mubr.bf16.gmra.mrb[24].mxu1 %v1267_v21 }
 0x170   : > { %765 = vmatprep.mubr.bf16.mxu1 %v1268_v22 }
 0x177   : > { %766 = vmatmul.mubr.bf16.gmra.mrb[28].mxu1 %v1270_v23 }
 0x212   : > { %v1119_v26 = vpop.f32.mrb[0].mxu1 }
 0x213   : > { %v1120_v27 = vpop.f32.mrb[1].mxu1 }
 0x214   : > { %v1121_v29 = vadd.f32 %v1120_v27, %v1119_v26  ;;  %v1122_v30 = vpop.f32.mrb[2].mxu1 }
 0x215   : > { %v1123_v31 = vpop.f32.mrb[3].mxu1 }
 0x216   : > { %v1124_v32 = vadd.f32 %v1123_v31, %v1122_v30  ;;  %v712_v33 = vadd.f32 %v1121_v29, %v1481_v28 }
 0x218   : > { %v1487_v34 = vsel %vm776_vm0, %v712_v33, -1e+30  ;;  %v715_v35 = vadd.f32 %v1124_v32, %v1481_v28 }
 0x219   : > { %793 = vmax.xlane.f32.xlu0 %v1487_v34 }
 0x21a   : > { %v1125_v36 = vpop.f32.mrb[4].mxu1  ;;  %v1493_v40 = vsel %vm776_vm0, %v715_v35, -1e+30 }
 0x21b   : > { %v1126_v37 = vpop.f32.mrb[5].mxu1 }
 0x21c   : > { %v1127_v38 = vadd.f32 %v1126_v37, %v1125_v36  ;;  %v1128_v39 = vpop.f32.mrb[6].mxu1 }
 0x21d   : > { %v1129_v41 = vpop.f32.mrb[7].mxu1  ;;  %795 = vmax.xlane.f32.xlu0 %v1493_v40 }
 0x21e   : > { %v1130_v42 = vadd.f32 %v1129_v41, %v1128_v39  ;;  %v720_v43 = vadd.f32 %v1127_v38, %v1481_v28 }
 0x220   : > { %v1499_v44 = vsel %vm776_vm0, %v720_v43, -1e+30  ;;  %v723_v45 = vadd.f32 %v1130_v42, %v1481_v28 }
 0x221   : > { %797 = vmax.xlane.f32.xlu1 %v1499_v44 }
 0x222   : > { %v1131_v46 = vpop.f32.mrb[8].mxu1  ;;  %v1505_v50 = vsel %vm776_vm0, %v723_v45, -1e+30 }
 0x223   : > { %v1132_v47 = vpop.f32.mrb[9].mxu1 }
 0x224   : > { %v1133_v48 = vadd.f32 %v1132_v47, %v1131_v46  ;;  %v1134_v49 = vpop.f32.mrb[10].mxu1 }
 0x225   : > { %v1135_v51 = vpop.f32.mrb[11].mxu1  ;;  %799 = vmax.xlane.f32.xlu1 %v1505_v50 }
 0x226   : > { %v1136_v52 = vadd.f32 %v1135_v51, %v1134_v49  ;;  %v728_v53 = vadd.f32 %v1133_v48, %v1481_v28 }
 0x228   : > { %v1511_v54 = vsel %vm776_vm0, %v728_v53, -1e+30  ;;  %v731_v55 = vadd.f32 %v1136_v52, %v1481_v28 }
 0x229   : > { %801 = vmax.xlane.f32.xlu0 %v1511_v54 }
 0x22a   : > { %v1137_v56 = vpop.f32.mrb[12].mxu1  ;;  %v1517_v57 = vsel %vm776_vm0, %v731_v55, -1e+30 }
 0x22b   : > { %v1138_v58 = vpop.f32.mrb[13].mxu1  ;;  %803 = vmax.xlane.f32.xlu1 %v1517_v57 }
 0x22c   : > { %v1139_v59 = vadd.f32 %v1138_v58, %v1137_v56  ;;  %v1140_v60 = vpop.f32.mrb[14].mxu1 }
 0x22d   : > { %v1141_v61 = vpop.f32.mrb[15].mxu1 }
 0x22e   : > { %v1142_v62 = vadd.f32 %v1141_v61, %v1140_v60  ;;  %v736_v63 = vadd.f32 %v1139_v59, %v1481_v28 }
 0x230   : > { %v1523_v0 = vsel %vm776_vm0, %v736_v63, -1e+30  ;;  %v739_v1 = vadd.f32 %v1142_v62, %v1481_v28 }
 0x231   : > { %805 = vmax.xlane.f32.xlu0 %v1523_v0 }
 0x232   : > { %v1143_v2 = vpop.f32.mrb[16].mxu1  ;;  %v1529_v3 = vsel %vm776_vm0, %v739_v1, -1e+30 }
 0x233   : > { %v1144_v4 = vpop.f32.mrb[17].mxu1  ;;  %807 = vmax.xlane.f32.xlu1 %v1529_v3 }
 0x234   : > { %v1145_v5 = vadd.f32 %v1144_v4, %v1143_v2  ;;  %v1146_v6 = vpop.f32.mrb[18].mxu1 }
 0x235   : > { %v1147_v7 = vpop.f32.mrb[19].mxu1 }
 0x236   : > { %v1148_v8 = vadd.f32 %v1147_v7, %v1146_v6  ;;  %v744_v9 = vadd.f32 %v1145_v5, %v1481_v28 }
 0x238   : > { %v1535_v10 = vsel %vm776_vm0, %v744_v9, -1e+30  ;;  %v747_v11 = vadd.f32 %v1148_v8, %v1481_v28 }
 0x239   : > { %809 = vmax.xlane.f32.xlu0 %v1535_v10 }
 0x23a   : > { %v1149_v12 = vpop.f32.mrb[20].mxu1  ;;  %v1541_v13 = vsel %vm776_vm0, %v747_v11, -1e+30 }
 0x23b   : > { %v1150_v14 = vpop.f32.mrb[21].mxu1  ;;  %811 = vmax.xlane.f32.xlu1 %v1541_v13 }
 0x23c   : > { %v1151_v15 = vadd.f32 %v1150_v14, %v1149_v12  ;;  %v1152_v16 = vpop.f32.mrb[22].mxu1 }
 0x23d   : > { %v1153_v17 = vpop.f32.mrb[23].mxu1 }
 0x23e   : > { %v1154_v18 = vadd.f32 %v1153_v17, %v1152_v16  ;;  %v752_v19 = vadd.f32 %v1151_v15, %v1481_v28 }
 0x240   : > { %v1547_v20 = vsel %vm776_vm0, %v752_v19, -1e+30  ;;  %v755_v21 = vadd.f32 %v1154_v18, %v1481_v28 }
 0x241   : > { %813 = vmax.xlane.f32.xlu0 %v1547_v20 }
 0x242   : > { %v1155_v22 = vpop.f32.mrb[24].mxu1  ;;  %v1553_v23 = vsel %vm776_vm0, %v755_v21, -1e+30 }
 0x243   : > { %v1156_v24 = vpop.f32.mrb[25].mxu1  ;;  %815 = vmax.xlane.f32.xlu1 %v1553_v23 }
 0x244   : > { %v1157_v26 = vadd.f32 %v1156_v24, %v1155_v22  ;;  %v1158_v27 = vpop.f32.mrb[26].mxu1 }
 0x245   : > { %v1159_v29 = vpop.f32.mrb[27].mxu1 }
 0x246   : > { %v1160_v30 = vadd.f32 %v1159_v29, %v1158_v27  ;;  %v760_v31 = vadd.f32 %v1157_v26, %v1481_v28 }
 0x248   : > { %v1559_v32 = vsel %vm776_vm0, %v760_v31, -1e+30  ;;  %v763_v33 = vadd.f32 %v1160_v30, %v1481_v28 }
 0x249   : > { %817 = vmax.xlane.f32.xlu0 %v1559_v32 }
 0x24a   : > { %v1161_v35 = vpop.f32.mrb[28].mxu1  ;;  %v1565_v36 = vsel %vm776_vm0, %v763_v33, -1e+30 }
 0x24b   : > { %v1162_v37 = vpop.f32.mrb[29].mxu1  ;;  %819 = vmax.xlane.f32.xlu1 %v1565_v36 }
 0x24c   : > { %v1163_v38 = vadd.f32 %v1162_v37, %v1161_v35  ;;  %v1164_v39 = vpop.f32.mrb[30].mxu1 }
 0x24d   : > { %v1165_v41 = vpop.f32.mrb[31].mxu1 }
 0x24e   : > { %v1166_v42 = vadd.f32 %v1165_v41, %v1164_v39  ;;  %v768_v43 = vadd.f32 %v1163_v38, %v1481_v28 }
 0x250   : > { %v1571_v45 = vsel %vm776_vm0, %v768_v43, -1e+30  ;;  %v771_v46 = vadd.f32 %v1166_v42, %v1481_v28 }
 0x251   : > { %821 = vmax.xlane.f32.xlu0 %v1571_v45 }
 0x252   : > { %v1577_v47 = vsel %vm776_vm0, %v771_v46, -1e+30 }
 0x253   : > { %823 = vmax.xlane.f32.xlu1 %v1577_v47 }
 0x2a6   : > { %v794_v48 = vpop.xlane.xlu0 %793 }
 0x2a7   : > { %v1581_v49 = vsub.f32 %v1487_v34, %v794_v48 }
 0x2a9   : > { %v841_v51 = vmul.f32 1.442695, %v1581_v49 }
 0x2aa   : > { %v796_v52 = vpop.xlane.xlu0 %795 }
 0x2ab   : > { %1271 = vpow2.f32 %v841_v51  ;;  %v1585_v53 = vsub.f32 %v1493_v40, %v796_v52 }
 0x2ad   : > { %v843_v28 = vmul.f32 1.442695, %v1585_v53 }
 0x2ae   : > { %v798_v55 = vpop.xlane.xlu1 %797 }
 0x2af   : > { %1273 = vpow2.f32 %v843_v28  ;;  %v1589_v25 = vsub.f32 %v1499_v44, %v798_v55 }
 0x2b1   : > { %v845_v56 = vmul.f32 1.442695, %v1589_v25 }
 0x2b2   : > { %v800_v58 = vpop.xlane.xlu1 %799 }
 0x2b3   : > { %1275 = vpow2.f32 %v845_v56  ;;  %v1593_v34 = vsub.f32 %v1505_v50, %v800_v58 }
 0x2b5   : > { %v1272_v59 = vpop.eup %1271  ;;  %v847_v60 = vmul.f32 1.442695, %v1593_v34 }
 0x2b6   : > { %873 = vadd.xlane.f32.xlu0 %v1272_v59  ;;  %v802_v40 = vpop.xlane.xlu0 %801 }
 0x2b7   : > { %1277 = vpow2.f32 %v847_v60  ;;  %v1597_v61 = vsub.f32 %v1511_v54, %v802_v40 }
 0x2b8   : > { %v804_v62 = vpop.xlane.xlu1 %803 }
 0x2b9   : > { %v1274_v63 = vpop.eup %1273  ;;  %v849_v44 = vmul.f32 1.442695, %v1597_v61  ;;  %v1601_v1 = vsub.f32 %v1517_v57, %v804_v62 }
 0x2ba   : > { %875 = vadd.xlane.f32.xlu1 %v1274_v63 }
 0x2bb   : > { %1279 = vpow2.f32 %v849_v44  ;;  %v851_v50 = vmul.f32 1.442695, %v1601_v1 }
 0x2bd   : > { %v1276_v2 = vpop.eup %1275  ;;  %1281 = vpow2.f32 %v851_v50 }
 0x2be   : > { %877 = vadd.xlane.f32.xlu0 %v1276_v2  ;;  %v806_v4 = vpop.xlane.xlu0 %805 }
 0x2bf   : > { %v1605_v5 = vsub.f32 %v1523_v0, %v806_v4 }
 0x2c0   : > { %v808_v54 = vpop.xlane.xlu1 %807 }
 0x2c1   : > { %v1278_v6 = vpop.eup %1277  ;;  %v853_v7 = vmul.f32 1.442695, %v1605_v5  ;;  %v1609_v8 = vsub.f32 %v1529_v3, %v808_v54 }
 0x2c2   : > { %879 = vadd.xlane.f32.xlu1 %v1278_v6 }
 0x2c3   : > { %1283 = vpow2.f32 %v853_v7  ;;  %v855_v57 = vmul.f32 1.442695, %v1609_v8 }
 0x2c5   : > { %v1280_v9 = vpop.eup %1279  ;;  %1285 = vpow2.f32 %v855_v57 }
 0x2c6   : > { %881 = vadd.xlane.f32.xlu0 %v1280_v9  ;;  %v810_v11 = vpop.xlane.xlu0 %809 }
 0x2c7   : > { %v1282_v12 = vpop.eup %1281  ;;  %v1613_v14 = vsub.f32 %v1535_v10, %v810_v11 }
 0x2c8   : > { %v812_v0 = vpop.xlane.xlu1 %811  ;;  %883 = vadd.xlane.f32.xlu1 %v1282_v12 }
 0x2c9   : > { %v857_v15 = vmul.f32 1.442695, %v1613_v14  ;;  %v1617_v16 = vsub.f32 %v1541_v13, %v812_v0 }
 0x2cb   : > { %1287 = vpow2.f32 %v857_v15  ;;  %v859_v3 = vmul.f32 1.442695, %v1617_v16 }
 0x2cd   : > { %v1284_v17 = vpop.eup %1283  ;;  %1289 = vpow2.f32 %v859_v3 }
 0x2ce   : > { %885 = vadd.xlane.f32.xlu0 %v1284_v17  ;;  %v814_v18 = vpop.xlane.xlu0 %813 }
 0x2cf   : > { %v1286_v19 = vpop.eup %1285  ;;  %v1621_v21 = vsub.f32 %v1547_v20, %v814_v18 }
 0x2d0   : > { %v816_v10 = vpop.xlane.xlu1 %815  ;;  %887 = vadd.xlane.f32.xlu1 %v1286_v19 }
 0x2d1   : > { %v861_v22 = vmul.f32 1.442695, %v1621_v21  ;;  %v1625_v24 = vsub.f32 %v1553_v23, %v816_v10 }
 0x2d3   : > { %1291 = vpow2.f32 %v861_v22  ;;  %v863_v13 = vmul.f32 1.442695, %v1625_v24 }
 0x2d5   : > { %v1288_v26 = vpop.eup %1287  ;;  %1293 = vpow2.f32 %v863_v13 }
 0x2d6   : > { %889 = vadd.xlane.f32.xlu0 %v1288_v26  ;;  %v818_v27 = vpop.xlane.xlu0 %817 }
 0x2d7   : > { %v1290_v29 = vpop.eup %1289  ;;  %v1629_v30 = vsub.f32 %v1559_v32, %v818_v27 }
 0x2d8   : > { %v820_v20 = vpop.xlane.xlu1 %819  ;;  %891 = vadd.xlane.f32.xlu1 %v1290_v29 }
 0x2d9   : > { %v865_v31 = vmul.f32 1.442695, %v1629_v30  ;;  %v1633_v33 = vsub.f32 %v1565_v36, %v820_v20 }
 0x2db   : > { %1295 = vpow2.f32 %v865_v31  ;;  %v867_v23 = vmul.f32 1.442695, %v1633_v33 }
 0x2dd   : > { %v1292_v35 = vpop.eup %1291  ;;  %1297 = vpow2.f32 %v867_v23 }
 0x2de   : > { %893 = vadd.xlane.f32.xlu0 %v1292_v35  ;;  %v822_v37 = vpop.xlane.xlu0 %821 }
 0x2df   : > { %v1294_v38 = vpop.eup %1293  ;;  %v1637_v39 = vsub.f32 %v1571_v45, %v822_v37 }
 0x2e0   : > { %v824_v32 = vpop.xlane.xlu1 %823  ;;  %895 = vadd.xlane.f32.xlu1 %v1294_v38 }
 0x2e1   : > { %v869_v41 = vmul.f32 1.442695, %v1637_v39  ;;  %v1641_v42 = vsub.f32 %v1577_v47, %v824_v32 }
 0x2e3   : > { %1299 = vpow2.f32 %v869_v41  ;;  %v871_v36 = vmul.f32 1.442695, %v1641_v42 }
 0x2e5   : > { %v1296_v43 = vpop.eup %1295  ;;  %1301 = vpow2.f32 %v871_v36 }
 0x2e6   : > { %897 = vadd.xlane.f32.xlu0 %v1296_v43 }
 0x2e7   : > { %v1298_v46 = vpop.eup %1297 }
 0x2e8   : > { %899 = vadd.xlane.f32.xlu1 %v1298_v46 }
 0x2ed   : > { %v1300_v48 = vpop.eup %1299 }
 0x2ee   : > { %901 = vadd.xlane.f32.xlu0 %v1300_v48 }
 0x2ef   : > { %v1302_v45 = vpop.eup %1301 }
 0x2f0   : > { %903 = vadd.xlane.f32.xlu1 %v1302_v45 }
 0x343   : > { %v874_v51 = vpop.xlane.xlu0 %873 }
 0x344   : > { %1303 = vlog2.f32 %v874_v51 }
 0x347   : > { %v876_v52 = vpop.xlane.xlu1 %875 }
 0x348   : > { %1305 = vlog2.f32 %v876_v52 }
 0x34b   : > { %v878_v28 = vpop.xlane.xlu0 %877 }
 0x34c   : > { %1307 = vlog2.f32 %v878_v28 }
 0x34e   : > { %v1304_v47 = vpop.eup %1303 }
 0x34f   : > { %v906_v55 = vmul.f32 0.6931472, %v1304_v47  ;;  %v880_v56 = vpop.xlane.xlu1 %879 }
 0x350   : > { %1309 = vlog2.f32 %v880_v56 }
 0x351   : > { %v937_v58 = vsub.f32 %v1581_v49, %v906_v55 }
 0x352   : > { %v1306_v59 = vpop.eup %1305 }
 0x353   : > { %953 = vst [vmem:[%s1649_s25] sm:$0xff] %v937_v58  ;;  %v908_v60 = vmul.f32 0.6931472, %v1306_v59  ;;  %v882_v40 = vpop.xlane.xlu0 %881 }
 0x354   : > { %1311 = vlog2.f32 %v882_v40 }
 0x355   : > { %v938_v62 = vsub.f32 %v1585_v53, %v908_v60  ;;  %v884_v63 = vpop.xlane.xlu1 %883 }
 0x356   : > { %v1308_v44 = vpop.eup %1307  ;;  %1313 = vlog2.f32 %v884_v63 }
 0x357   : > { %954 = vst [vmem:[%s1649_s25 + $0x8] sm:$0xff] %v938_v62  ;;  %v910_v50 = vmul.f32 0.6931472, %v1308_v44 }
 0x359   : > { %v939_v2 = vsub.f32 %v1589_v25, %v910_v50 }
 0x35a   : > { %v1310_v4 = vpop.eup %1309 }
 0x35b   : > { %955 = vst [vmem:[%s1649_s25 + $0x10] sm:$0xff] %v939_v2  ;;  %v912_v54 = vmul.f32 0.6931472, %v1310_v4  ;;  %v886_v49 = vpop.xlane.xlu0 %885 }
 0x35c   : > { %1315 = vlog2.f32 %v886_v49 }
 0x35d   : > { %v940_v6 = vsub.f32 %v1593_v34, %v912_v54  ;;  %v888_v7 = vpop.xlane.xlu1 %887 }
 0x35e   : > { %v1312_v57 = vpop.eup %1311  ;;  %1317 = vlog2.f32 %v888_v7 }
 0x35f   : > { %956 = vst [vmem:[%s1649_s25 + $0x18] sm:$0xff] %v940_v6  ;;  %v914_v53 = vmul.f32 0.6931472, %v1312_v57 }
 0x360   : > { %v1314_v9 = vpop.eup %1313 }
 0x361   : > { %v941_v11 = vsub.f32 %v1597_v61, %v914_v53  ;;  %v916_v12 = vmul.f32 0.6931472, %v1314_v9 }
 0x363   : > { %957 = vst [vmem:[%s1649_s25 + $0x20] sm:$0xff] %v941_v11  ;;  %v942_v25 = vsub.f32 %v1601_v1, %v916_v12  ;;  %v890_v0 = vpop.xlane.xlu0 %889 }
 0x364   : > { %1319 = vlog2.f32 %v890_v0 }
 0x365   : > { %958 = vst [vmem:[%s1649_s25 + $0x28] sm:$0xff] %v942_v25  ;;  %v892_v15 = vpop.xlane.xlu1 %891 }
 0x366   : > { %v1316_v3 = vpop.eup %1315  ;;  %1321 = vlog2.f32 %v892_v15 }
 0x367   : > { %v918_v34 = vmul.f32 0.6931472, %v1316_v3 }
 0x368   : > { %v1318_v17 = vpop.eup %1317 }
 0x369   : > { %v943_v18 = vsub.f32 %v1605_v5, %v918_v34  ;;  %v920_v19 = vmul.f32 0.6931472, %v1318_v17 }
 0x36b   : > { %959 = vst [vmem:[%s1649_s25 + $0x30] sm:$0xff] %v943_v18  ;;  %v944_v61 = vsub.f32 %v1609_v8, %v920_v19  ;;  %v894_v10 = vpop.xlane.xlu0 %893 }
 0x36c   : > { %1323 = vlog2.f32 %v894_v10 }
 0x36d   : > { %960 = vst [vmem:[%s1649_s25 + $0x38] sm:$0xff] %v944_v61  ;;  %v896_v1 = vpop.xlane.xlu1 %895 }
 0x36e   : > { %v1320_v22 = vpop.eup %1319  ;;  %1325 = vlog2.f32 %v896_v1 }
 0x36f   : > { %v922_v13 = vmul.f32 0.6931472, %v1320_v22 }
 0x370   : > { %v1322_v26 = vpop.eup %1321 }
 0x371   : > { %v945_v27 = vsub.f32 %v1613_v14, %v922_v13  ;;  %v924_v29 = vmul.f32 0.6931472, %v1322_v26 }
 0x373   : > { %961 = vst [vmem:[%s1649_s25 + $0x40] sm:$0xff] %v945_v27  ;;  %v946_v5 = vsub.f32 %v1617_v16, %v924_v29  ;;  %v898_v20 = vpop.xlane.xlu0 %897 }
 0x374   : > { %1327 = vlog2.f32 %v898_v20 }
 0x375   : > { %962 = vst [vmem:[%s1649_s25 + $0x48] sm:$0xff] %v946_v5  ;;  %v900_v8 = vpop.xlane.xlu1 %899 }
 0x376   : > { %v1324_v31 = vpop.eup %1323  ;;  %1329 = vlog2.f32 %v900_v8 }
 0x377   : > { %v926_v23 = vmul.f32 0.6931472, %v1324_v31 }
 0x378   : > { %v1326_v35 = vpop.eup %1325 }
 0x379   : > { %v947_v37 = vsub.f32 %v1621_v21, %v926_v23  ;;  %v928_v38 = vmul.f32 0.6931472, %v1326_v35 }
 0x37b   : > { %963 = vst [vmem:[%s1649_s25 + $0x50] sm:$0xff] %v947_v37  ;;  %v948_v14 = vsub.f32 %v1625_v24, %v928_v38  ;;  %v902_v32 = vpop.xlane.xlu0 %901 }
 0x37c   : > { %1331 = vlog2.f32 %v902_v32 }
 0x37d   : > { %964 = vst [vmem:[%s1649_s25 + $0x58] sm:$0xff] %v948_v14  ;;  %v904_v16 = vpop.xlane.xlu1 %903 }
 0x37e   : > { %v1328_v41 = vpop.eup %1327  ;;  %1333 = vlog2.f32 %v904_v16 }
 0x37f   : > { %v930_v36 = vmul.f32 0.6931472, %v1328_v41 }
 0x380   : > { %v1330_v43 = vpop.eup %1329 }
 0x381   : > { %v949_v46 = vsub.f32 %v1629_v30, %v930_v36  ;;  %v932_v48 = vmul.f32 0.6931472, %v1330_v43 }
 0x383   : > { %965 = vst [vmem:[%s1649_s25 + $0x60] sm:$0xff] %v949_v46  ;;  %v950_v21 = vsub.f32 %v1633_v33, %v932_v48 }
 0x385   : > { %966 = vst [vmem:[%s1649_s25 + $0x68] sm:$0xff] %v950_v21 }
 0x386   : > { %v1332_v45 = vpop.eup %1331 }
 0x387   : > { %v934_v51 = vmul.f32 0.6931472, %v1332_v45 }
 0x388   : > { %v1334_v24 = vpop.eup %1333 }
 0x389   : > { %v951_v52 = vsub.f32 %v1637_v39, %v934_v51  ;;  %v936_v28 = vmul.f32 0.6931472, %v1334_v24 }
 0x38b   : > { %967 = vst [vmem:[%s1649_s25 + $0x70] sm:$0xff] %v951_v52  ;;  %v952_v47 = vsub.f32 %v1641_v42, %v936_v28 }
 0x38d   : > { %968 = vst [vmem:[%s1649_s25 + $0x78] sm:$0xff] %v952_v47 }
 0x38e PF: > { %s14_s15 = sadd.s32 1, %s1341_s15  }
 0x38f   : > { %p11_p4 = scmp.ge.s32.totalorder %s14_s15, 4  }
 0x391   :  { %13 = sbr.rel (!%p11_p4) target bundleno = 1 (0x1), region = 66 }

</bundles_post_ra>
